<compile_context>
chip_gen: v7x
topology: tpu7x:2x2x1
jax: 0.10.0
libtpu: 0.0.40
codegen_flags: <defaults>
</compile_context>

<pallas_src>
import math
import jax
import jax.numpy as jnp
from jax.experimental import pallas as pl
from jax.experimental.pallas import tpu as pltpu


_INV_SQRT2 = 1.0 / math.sqrt(2.0)


def _ffn_kernel(x_ref, w1_ref, b1_ref, w2_ref, b2_ref, o_ref, acc_ref):
    # x_ref: (tm, C)   w1_ref: (C, th)   b1_ref: (1, th)
    # w2_ref: (th, C)  b2_ref: (1, C)    o_ref: (tm, C)   acc_ref: (tm, C) f32
    j = pl.program_id(1)

    # Init the accumulator with the second bias (folds the b2 add into init,
    # avoiding a per-step broadcast).
    @pl.when(j == 0)
    def _():
        acc_ref[...] = jnp.broadcast_to(
            b2_ref[...].astype(jnp.float32), acc_ref.shape)

    x = x_ref[...]
    # First linear: fp32 accumulation on the MXU, bias + GELU in fp32.
    h = jnp.dot(x, w1_ref[...], preferred_element_type=jnp.float32)
    h = h + b1_ref[...].astype(jnp.float32)
    # Exact erf GELU (torch.nn.GELU() default).
    h = 0.5 * h * (1.0 + jax.lax.erf(h * _INV_SQRT2))

    # Second linear: partial contraction over this hidden slab, accumulate.
    acc_ref[...] += jnp.dot(h.astype(w2_ref.dtype), w2_ref[...],
                            preferred_element_type=jnp.float32)

    @pl.when(j == pl.num_programs(1) - 1)
    def _():
        # Dropout (eval mode) is identity -> nothing else to do.
        o_ref[...] = acc_ref[...].astype(o_ref.dtype)
        # TODO(synk): training-mode dropout (RNG mask) not implemented.


def _round_up(x, m):
    return (x + m - 1) // m * m


def feed_forward(x, w1, b1, w2, b2, *, tm=256, th=512, vmem_limit_bytes=None):
    """x: (B, T, C). Returns (B, T, C)."""
    B, T, C = x.shape
    H = w1.shape[1]
    M = B * T

    # Row tile: big enough to fill the MXU; 16-aligned for bf16 packing,
    # clamped (and input padded) for small M.
    row_align = 16 if x.dtype == jnp.bfloat16 else 8
    tm_eff = min(_round_up(tm, row_align), _round_up(M, row_align))
    M_pad = _round_up(M, tm_eff)

    # Hidden tile: stream W1/W2 in lane-aligned slabs; fall back to full H
    # when H is small or not divisible.
    th_eff = min(th, H)
    if th_eff < H:
        th_eff = max(128, (th_eff // 128) * 128)
    if th_eff >= H or H % th_eff != 0:
        th_eff = H

    x2 = x.reshape(M, C)
    if M_pad != M:
        x2 = jnp.pad(x2, ((0, M_pad - M), (0, 0)))
    b1 = b1.reshape(1, H)
    b2 = b2.reshape(1, C)

    if vmem_limit_bytes is None:
        eb = jnp.dtype(x.dtype).itemsize
        # Double-buffered streamed blocks + fp32 accumulator scratch.
        est = 2 * eb * (tm_eff * C + C * th_eff + th_eff
                        + th_eff * C + C + tm_eff * C) + 4 * tm_eff * C
        vmem_limit_bytes = int(min(max(2 * est, 32 * 1024 * 1024),
                                   64 * 1024 * 1024))

    out = pl.pallas_call(
        _ffn_kernel,
        out_shape=jax.ShapeDtypeStruct((M_pad, C), x.dtype),
        grid_spec=pltpu.PrefetchScalarGridSpec(
            num_scalar_prefetch=0,
            grid=(M_pad // tm_eff, H // th_eff),
            in_specs=[
                pl.BlockSpec((tm_eff, C), lambda i, j: (i, 0)),   # x rows (resident over j)
                pl.BlockSpec((C, th_eff), lambda i, j: (0, j)),   # W1 column slab
                pl.BlockSpec((1, th_eff), lambda i, j: (0, j)),   # b1 slab
                pl.BlockSpec((th_eff, C), lambda i, j: (j, 0)),   # W2 row slab
                pl.BlockSpec((1, C), lambda i, j: (0, 0)),        # b2 (constant)
            ],
            out_specs=pl.BlockSpec((tm_eff, C), lambda i, j: (i, 0)),
            scratch_shapes=[pltpu.VMEM((tm_eff, C), jnp.float32)],
        ),
        compiler_params=pltpu.CompilerParams(
            dimension_semantics=("parallel", "arbitrary"),
            vmem_limit_bytes=vmem_limit_bytes),
    )(x2, w1, b1, w2, b2)

    if M_pad != M:
        out = out[:M]
    return out.reshape(B, T, C)


def init_params(key, n_embd, dtype=jnp.float32):
    """Deterministic init mimicking nn.Linear default (uniform +- 1/sqrt(fan_in))."""
    hidden = 4 * n_embd
    k1, k2, k3, k4 = jax.random.split(key, 4)
    lim1 = 1.0 / math.sqrt(n_embd)
    lim2 = 1.0 / math.sqrt(hidden)
    w1 = jax.random.uniform(k1, (n_embd, hidden), jnp.float32, -lim1, lim1).astype(dtype)
    b1 = jax.random.uniform(k2, (1, hidden), jnp.float32, -lim1, lim1).astype(dtype)
    w2 = jax.random.uniform(k3, (hidden, n_embd), jnp.float32, -lim2, lim2).astype(dtype)
    b2 = jax.random.uniform(k4, (1, n_embd), jnp.float32, -lim2, lim2).astype(dtype)
    return w1, b1, w2, b2


def _reference(x, w1, b1, w2, b2):
    B, T, C = x.shape
    x2 = x.reshape(-1, C).astype(jnp.float32)
    h = jnp.dot(x2, w1.astype(jnp.float32),
                precision=jax.lax.Precision.HIGHEST) + b1.astype(jnp.float32)
    h = 0.5 * h * (1.0 + jax.lax.erf(h * _INV_SQRT2))
    y = jnp.dot(h, w2.astype(jnp.float32),
                precision=jax.lax.Precision.HIGHEST) + b2.astype(jnp.float32)
    return y.reshape(B, T, C)


if __name__ == "__main__":
    key = jax.random.PRNGKey(0)

    # --- Small toy shape (matches the module's toy config). -----------------
    B, T, n_embd = 2, 8, 32
    kx, kp, kx2, kp2 = jax.random.split(key, 4)
    x = jax.random.normal(kx, (B, T, n_embd), jnp.float32)
    w1, b1, w2, b2 = init_params(kp, n_embd)

    y = feed_forward(x, w1, b1, w2, b2)
    y = jax.block_until_ready(y)
    y_ref = _reference(x, w1, b1, w2, b2)
    assert jnp.allclose(y, y_ref, atol=1e-4, rtol=1e-4), "toy-shape mismatch"

    # --- Larger shape exercising both grid axes (row tiles + hidden slabs). -
    B2, T2, C2 = 2, 256, 256
    x_big = jax.random.normal(kx2, (B2, T2, C2), jnp.float32)
    w1b, b1b, w2b, b2b = init_params(kp2, C2)

    y_big = feed_forward(x_big, w1b, b1b, w2b, b2b, tm=256, th=512)
    y_big = jax.block_until_ready(y_big)
    y_big_ref = _reference(x_big, w1b, b1b, w2b, b2b)
    assert jnp.allclose(y_big, y_big_ref, atol=1e-2, rtol=1e-2), "big-shape mismatch"

    print("KERNEL_OK")
</pallas_src>

<mosaic_0001>
module attributes {stable_mosaic.version = 11 : i64} {
  func.func @_ffn_kernel(%arg0: i32, %arg1: i32, %arg2: memref<16x32xf32, #tpu.memory_space<vmem>>, %arg3: memref<32x128xf32, #tpu.memory_space<vmem>>, %arg4: memref<1x128xf32, #tpu.memory_space<vmem>>, %arg5: memref<128x32xf32, #tpu.memory_space<vmem>>, %arg6: memref<1x32xf32, #tpu.memory_space<vmem>>, %arg7: memref<16x32xf32, #tpu.memory_space<vmem>>, %arg8: memref<16x32xf32, #tpu.memory_space<vmem>>) attributes {dimension_semantics = [#tpu.dimension_semantics<parallel>, #tpu.dimension_semantics<arbitrary>], iteration_bounds = array<i64: 1, 1>, scalar_prefetch = 0 : i64, scratch_operands = 1 : i64, tpu.core_type = #tpu.core_type<tc>, window_params = [{transform_indices = @transform_0, window_bounds = array<i64: 16, 32>}, {transform_indices = @transform_1, window_bounds = array<i64: 32, 128>}, {transform_indices = @transform_2, window_bounds = array<i64: 1, 128>}, {transform_indices = @transform_3, window_bounds = array<i64: 128, 32>}, {pipeline_mode = #tpu.pipeline_mode<synchronous>, transform_indices = @transform_4, window_bounds = array<i64: 1, 32>}, {transform_indices = @transform_5, window_bounds = array<i64: 16, 32>}]} {
    %c0_i32 = arith.constant 0 : i32
    %0 = arith.cmpi eq, %arg1, %c0_i32 : i32
    %1 = arith.extui %0 : i1 to i32
    %c0_i32_0 = arith.constant 0 : i32
    %2 = arith.cmpi ne, %1, %c0_i32_0 : i32
    scf.if %2 {
      %c0_18 = arith.constant 0 : index
      %c0_19 = arith.constant 0 : index
      %25 = vector.load %arg6[%c0_18, %c0_19] : memref<1x32xf32, #tpu.memory_space<vmem>>, vector<1x32xf32>
      %26 = vector.shape_cast %25 : vector<1x32xf32> to vector<1x32xf32>
      %27 = vector.broadcast %26 : vector<1x32xf32> to vector<16x32xf32>
      %c0_20 = arith.constant 0 : index
      %c0_21 = arith.constant 0 : index
      %28 = vector.load %arg8[%c0_20, %c0_21] : memref<16x32xf32, #tpu.memory_space<vmem>>, vector<16x32xf32>
      tpu.vector_store %arg8[%c0_20, %c0_21], %27 {strides = array<i32>} : memref<16x32xf32, #tpu.memory_space<vmem>>, vector<16x32xf32>,
    } else {
    }
    %c0 = arith.constant 0 : index
    %c0_1 = arith.constant 0 : index
    %3 = vector.load %arg2[%c0, %c0_1] : memref<16x32xf32, #tpu.memory_space<vmem>>, vector<16x32xf32>
    %c0_2 = arith.constant 0 : index
    %c0_3 = arith.constant 0 : index
    %4 = vector.load %arg3[%c0_2, %c0_3] : memref<32x128xf32, #tpu.memory_space<vmem>>, vector<32x128xf32>
    %cst = arith.constant dense<0.000000e+00> : vector<16x128xf32>
    %5 = tpu.matmul %3, %4, %cst {dimension_numbers = #tpu.dot_dimension_numbers<[1], [0], [0], [1], [0, 0, 1, 1], [], []>} : vector<16x32xf32>, vector<32x128xf32>, vector<16x128xf32> -> vector<16x128xf32>
    %c0_4 = arith.constant 0 : index
    %c0_5 = arith.constant 0 : index
    %6 = vector.load %arg4[%c0_4, %c0_5] : memref<1x128xf32, #tpu.memory_space<vmem>>, vector<1x128xf32>
    %7 = vector.broadcast %6 : vector<1x128xf32> to vector<16x128xf32>
    %8 = arith.addf %5, %7 : vector<16x128xf32>
    %cst_6 = arith.constant 5.000000e-01 : f32
    %9 = vector.broadcast %cst_6 : f32 to vector<16x128xf32>
    %10 = arith.mulf %9, %8 : vector<16x128xf32>
    %cst_7 = arith.constant 0.707106769 : f32
    %11 = vector.broadcast %cst_7 : f32 to vector<16x128xf32>
    %12 = arith.mulf %8, %11 : vector<16x128xf32>
    %13 = math.erf %12 : vector<16x128xf32>
    %cst_8 = arith.constant 1.000000e+00 : f32
    %14 = vector.broadcast %cst_8 : f32 to vector<16x128xf32>
    %15 = arith.addf %14, %13 : vector<16x128xf32>
    %16 = arith.mulf %10, %15 : vector<16x128xf32>
    %c0_9 = arith.constant 0 : index
    %c0_10 = arith.constant 0 : index
    %17 = vector.load %arg8[%c0_9, %c0_10] : memref<16x32xf32, #tpu.memory_space<vmem>>, vector<16x32xf32>
    %c0_11 = arith.constant 0 : index
    %c0_12 = arith.constant 0 : index
    %18 = vector.load %arg5[%c0_11, %c0_12] : memref<128x32xf32, #tpu.memory_space<vmem>>, vector<128x32xf32>
    %cst_13 = arith.constant dense<0.000000e+00> : vector<16x32xf32>
    %19 = tpu.matmul %16, %18, %cst_13 {dimension_numbers = #tpu.dot_dimension_numbers<[1], [0], [0], [1], [0, 0, 1, 1], [], []>} : vector<16x128xf32>, vector<128x32xf32>, vector<16x32xf32> -> vector<16x32xf32>
    %20 = arith.addf %17, %19 : vector<16x32xf32>
    %c0_14 = arith.constant 0 : index
    %c0_15 = arith.constant 0 : index
    %21 = vector.load %arg8[%c0_14, %c0_15] : memref<16x32xf32, #tpu.memory_space<vmem>>, vector<16x32xf32>
    tpu.vector_store %arg8[%c0_14, %c0_15], %20 {strides = array<i32>} : memref<16x32xf32, #tpu.memory_space<vmem>>, vector<16x32xf32>,
    %c0_i32_16 = arith.constant 0 : i32
    %22 = arith.cmpi eq, %arg1, %c0_i32_16 : i32
    %23 = arith.extui %22 : i1 to i32
    %c0_i32_17 = arith.constant 0 : i32
    %24 = arith.cmpi ne, %23, %c0_i32_17 : i32
    scf.if %24 {
      %c0_18 = arith.constant 0 : index
      %c0_19 = arith.constant 0 : index
      %25 = vector.load %arg8[%c0_18, %c0_19] : memref<16x32xf32, #tpu.memory_space<vmem>>, vector<16x32xf32>
      %c0_20 = arith.constant 0 : index
      %c0_21 = arith.constant 0 : index
      %26 = vector.load %arg7[%c0_20, %c0_21] : memref<16x32xf32, #tpu.memory_space<vmem>>, vector<16x32xf32>
      tpu.vector_store %arg7[%c0_20, %c0_21], %25 {strides = array<i32>} : memref<16x32xf32, #tpu.memory_space<vmem>>, vector<16x32xf32>,
    } else {
    }
    return
  }
  func.func @transform_0(%arg0: i32, %arg1: i32) -> (i32, i32) {
    %c0_i32 = arith.constant 0 : i32
    %c0_i32_0 = arith.constant 0 : i32
    return %arg0, %c0_i32 : i32, i32
  }
  func.func @transform_1(%arg0: i32, %arg1: i32) -> (i32, i32) {
    %c0_i32 = arith.constant 0 : i32
    %c0_i32_0 = arith.constant 0 : i32
    return %c0_i32, %arg1 : i32, i32
  }
  func.func @transform_2(%arg0: i32, %arg1: i32) -> (i32, i32) {
    %c0_i32 = arith.constant 0 : i32
    %c0_i32_0 = arith.constant 0 : i32
    return %c0_i32, %arg1 : i32, i32
  }
  func.func @transform_3(%arg0: i32, %arg1: i32) -> (i32, i32) {
    %c0_i32 = arith.constant 0 : i32
    %c0_i32_0 = arith.constant 0 : i32
    return %arg1, %c0_i32 : i32, i32
  }
  func.func @transform_4(%arg0: i32, %arg1: i32) -> (i32, i32) {
    %c0_i32 = arith.constant 0 : i32
    %c0_i32_0 = arith.constant 0 : i32
    %c0_i32_1 = arith.constant 0 : i32
    return %c0_i32, %c0_i32_0 : i32, i32
  }
  func.func @transform_5(%arg0: i32, %arg1: i32) -> (i32, i32) {
    %c0_i32 = arith.constant 0 : i32
    %c0_i32_0 = arith.constant 0 : i32
    return %arg0, %c0_i32 : i32, i32
  }
}

</mosaic_0001>

<bundles_post_ra>
// kernel: tpu_custom_call.1
= control target key start
LH: loop header
LB: loop body
LE: loop exit
PB: predicated region body
PF: predicated region fallthrough
CT: control target
= control target key end

     0   :  { %vm32_vm0 = vcmask 261120   ;;  %s530_s0 = inlined_call_operand.vmem [shape: f32[16,32], index: 0, kind: input, shape index: {}]   ;;  %s531_s1 = inlined_call_operand.vmem [shape: f32[32,128], index: 1, kind: input, shape index: {}]   ;;  %s532_s2 = inlined_call_operand.vmem [shape: f32[1,128], index: 2, kind: input, shape index: {}]   ;;  %s533_s3 = inlined_call_operand.vmem [shape: f32[128,32], index: 3, kind: input, shape index: {}]   ;;  %s534_s4 = inlined_call_operand.vmem [shape: f32[1,32], index: 4, kind: input, shape index: {}]   ;;  %s535_s5 = inlined_call_operand.hbm [shape: f32[16,32], index: 5, kind: output, shape index: {}]  }
   0x1   :  { %v37_v0 = vld [vmem:[%s531_s1] sm:$0xff]  ;;  %v38_v1 = vld [vmem:[%s531_s1 + $0x8] sm:$0xff]  ;;  %v39_v2 = vld [vmem:[%s531_s1 + $0x10] sm:$0xff] }
   0x2   :  { %v334_v3 = vpack.c.bf16 %v38_v1, %v37_v0  ;;  %v40_v4 = vld [vmem:[%s531_s1 + $0x18] sm:$0xff]  ;;  %v35_v5 = vld [vmem:[%s530_s0] sm:$0xff]  ;;  %v143_v8 = vld [vmem:[%s533_s3 + $0x8] sm:$0xff] }
   0x3   :  { %v338_v6 = vpack.c.bf16 %v40_v4, %v39_v2  ;;  %296 = vmatprep.mubr.msk.f32.mxu0 %vm32_vm0, %v35_v5  ;;  %v142_v7 = vld [vmem:[%s533_s3] sm:$0xff]  ;;  %v144_v9 = vld [vmem:[%s533_s3 + $0x10] sm:$0xff]  ;;  %v145_v11 = vld [vmem:[%s533_s3 + $0x18] sm:$0xff] }
   0x4   :  { %335 = vmatprep.subr.bf16.mxu0 %v334_v3  ;;  %v342_v10 = vpack.c.bf16 %v143_v8, %v142_v7  ;;  %v346_v12 = vpack.c.bf16 %v145_v11, %v144_v9  ;;  %v146_v13 = vld [vmem:[%s533_s3 + $0x20] sm:$0xff]  ;;  %v147_v14 = vld [vmem:[%s533_s3 + $0x28] sm:$0xff] }
   0x5   :  { %337 = vmatpush3.bf16.msra.mxu0 %v334_v3 }
   0x6   :  { %10 = vsyncpa [#allocation4], 0  ;;  %339 = vmatprep.subr.bf16.mxu0 %v338_v6  ;;  %343 = vmatprep.subr.bf16.mxu1 %v342_v10  ;;  %v350_v15 = vpack.c.bf16 %v147_v14, %v146_v13  ;;  %v36_v16 = vld [vmem:[%s530_s0 + $0x8] sm:$0xff]  ;;  %v148_v17 = vld [vmem:[%s533_s3 + $0x30] sm:$0xff] }
   0x7   :  { %345 = vmatpush3.bf16.msra.mxu1 %v342_v10  ;;  %v149_v18 = vld [vmem:[%s533_s3 + $0x38] sm:$0xff]  ;;  %v150_v20 = vld [vmem:[%s533_s3 + $0x40] sm:$0xff]  ;;  %v151_v21 = vld [vmem:[%s533_s3 + $0x48] sm:$0xff] }
   0x8   :  { %347 = vmatprep.subr.bf16.mxu1 %v346_v12  ;;  %v354_v19 = vpack.c.bf16 %v149_v18, %v148_v17  ;;  %v358_v22 = vpack.c.bf16 %v151_v21, %v150_v20  ;;  %v152_v23 = vld [vmem:[%s533_s3 + $0x50] sm:$0xff]  ;;  %v153_v24 = vld [vmem:[%s533_s3 + $0x58] sm:$0xff]  ;;  %v154_v26 = vld [vmem:[%s533_s3 + $0x60] sm:$0xff] }
   0x9   :  { %341 = vmatpush3.bf16.msra.mxu0 %v338_v6  ;;  %v362_v25 = vpack.c.bf16 %v153_v24, %v152_v23  ;;  %v155_v27 = vld [vmem:[%s533_s3 + $0x68] sm:$0xff]  ;;  %v156_v29 = vld [vmem:[%s533_s3 + $0x70] sm:$0xff]  ;;  %v157_v30 = vld [vmem:[%s533_s3 + $0x78] sm:$0xff] }
   0xa   :  { %v366_v28 = vpack.c.bf16 %v155_v27, %v154_v26  ;;  %v370_v31 = vpack.c.bf16 %v157_v30, %v156_v29  ;;  %v260_v32 = vld [vmem:[%s534_s4] ss:$0 sm:$0xff] }
   0xb   :  { %349 = vmatpush3.bf16.msra.mxu1 %v346_v12  ;;  %34 = vst.msk [vmem:[#allocation2 + $0x8] sm:$0xff] %vm32_vm0, %v260_v32  ;;  %33 = vst.msk [vmem:[#allocation2] sm:$0xff] %vm32_vm0, %v260_v32  ;;  %v261_v33 = vld [vmem:[%s532_s2] ss:$0 sm:$0xff]  ;;  %s405_s2 = smov [#allocation3]  }
   0xc   :  { %297 = vmatmul.mubr.msk.f32.vlgmr.msra.gmra.mrb[0].mxu0 %vm32_vm0, %v36_v16  ;;  %351 = vmatprep.subr.bf16.mxu1 %v350_v15  ;;  %s249_s3 = sshll.u32 %s405_s2, 4  ;;  %s250_s3 = int_to_ptr.vmem [resolvable:$true] %s249_s3 }
   0xd   :  { %s381_s4 = scalar_lea.vmem %s250_s3, 256  ;;  %p386_p1 = scmp.lt.s32.totalorder %s250_s3, %s250_s3 }
   0xe   :  { %p382_p0 = scmp.ne.s32.totalorder %s250_s3, %s381_s4  ;;  %p387_p2 = scmp.lt.s32.totalorder %s381_s4, %s381_s4 }
   0xf   :  { %353 = vmatpush3.bf16.msra.mxu1 %v350_v15 }
  0x10   :  { %355 = vmatprep.subr.bf16.mxu1 %v354_v19  ;;  %p388_p3 = por %p387_p2, %p386_p1 }
  0x12   :  { %v141_v48 = vld [vmem:[#allocation2 + $0x8] sm:$0xff]  ;;  %v140_v49 = vld [vmem:[#allocation2] sm:$0xff]  ;;  %p389_p4 = pnand %p388_p3, %p382_p0 }
  0x13   :  { %357 = vmatpush3.bf16.msra.mxu1 %v354_v19 }
  0x14   :  { %359 = vmatprep.subr.bf16.mxu1 %v358_v22 }
  0x17   :  { %361 = vmatpush3.bf16.msra.mxu1 %v358_v22 }
  0x18   :  { %363 = vmatprep.subr.bf16.mxu1 %v362_v25 }
  0x1b   :  { %365 = vmatpush3.bf16.msra.mxu1 %v362_v25 }
  0x1c   :  { %367 = vmatprep.subr.bf16.mxu1 %v366_v28 }
  0x1f   :  { %369 = vmatpush3.bf16.msra.mxu1 %v366_v28 }
  0x20   :  { %371 = vmatprep.subr.bf16.mxu1 %v370_v31 }
  0x23   :  { %373 = vmatpush3.bf16.msra.mxu1 %v370_v31 }
  0xdf   :  { %v298_v34 = vpop.f32.mrb[0].mxu0 }
  0xe0   :  { %v127_v35 = vadd.f32 %v298_v34, %v261_v33  ;;  %v121_v36 = vpop.f32.mrb[1].mxu0 }
  0xe1   :  { %v122_v37 = vadd.f32 %v261_v33, %v121_v36 }
  0xe2   :  { %v133_v38 = vmul.f32 0.70710677, %v127_v35  ;;  %v131_v45 = vmul.f32 0.5, %v127_v35 }
  0xe3   :  { %v132_v39 = vmul.f32 0.70710677, %v122_v37  ;;  %v130_v43 = vmul.f32 0.5, %v122_v37 }
  0xe4   :  { %377 = verf.f32 %v133_v38 }
  0xe5   :  { %379 = verf.f32 %v132_v39 }
  0xee   :  { %v378_v40 = vpop.eup %377 }
  0xef   :  { %v380_v41 = vpop.eup %379  ;;  %v137_v42 = vadd.f32 1.0, %v378_v40 }
  0xf0   :  { %v136_v44 = vadd.f32 1.0, %v380_v41 }
  0xf1   :  { %v139_v47 = vmul.f32 %v137_v42, %v131_v45 }
  0xf2   :  { %v138_v46 = vmul.f32 %v136_v44, %v130_v43 }
  0xf4   :  { %331 = vmatprep.mubr.f32.mxu1 %v138_v46 }
  0xf5   :  { %332 = vmatmul.mubr.f32.vlgmr.msra.gmra.mrb[0].mxu1 %v139_v47 }
 0x1c8   :  { %v333_v50 = vpop.f32.mrb[0].mxu1 }
 0x1c9   :  { %v234_v51 = vadd.f32 %v333_v50, %v141_v48  ;;  %v224_v52 = vpop.f32.mrb[1].mxu1 }
 0x1ca   :  { %v233_v53 = vadd.f32 %v224_v52, %v140_v49 }
 0x1cb   :  { %236 = vst.msk [vmem:[#allocation2 + $0x8] sm:$0xff] %vm32_vm0, %v234_v51 }
 0x1cc   :  { %235 = vst.msk [vmem:[#allocation2] sm:$0xff] %vm32_vm0, %v233_v53 }
 0x1d2   :  { %v241_v54 = vld [vmem:[#allocation2 + $0x8] sm:$0xff] }
 0x1d3   :  { %v240_v55 = vld [vmem:[#allocation2] sm:$0xff]  ;;  %243 = vst.msk [vmem:[#allocation3 + $0x8] sm:$0xff] %vm32_vm0, %v241_v54 }
 0x1d4   :  { %242 = vst.msk [vmem:[#allocation3] sm:$0xff] %vm32_vm0, %v240_v55 }
 0x1d5   :  { %392 = shalt.err (!%p389_p4)
}
 0x1d6   :  { %s393_s15 = scalar_lea.hbm %s535_s5, 256 }
 0x1d7   :  { %p394_p5 = scmp.ne.s32.totalorder %s535_s5, %s393_s15  ;;  %p397_p6 = scmp.lt.u32.totalorder %s393_s15, %s535_s5 }
 0x1d9   :  { %p399_p7 = pnand %p397_p6, %p394_p5 }
 0x1db   :  { %402 = shalt.err (!%p399_p7)
}
 0x1dc   :  { %s406_s20 = smov 128   ;;  %s407_s21 = smov 8  }
 0x1dd   :  { %255 = dma.vmem_to_hbm [thread:$0]  %s250_s3, 256, %s535_s5, [#allocation4], %s406_s20, %s406_s20, %s407_s21  }
 0x1de   :  { %403 = dma.done.wait [#allocation4], 256  }
 0x1df   :  { %404 = vsyncadd [#allocation4], 4294967040 }
 0x1e0   :  { %259 = vsyncpa [#allocation4], 1 }

</bundles_post_ra>
